<compile_context>
chip_gen: v7x
topology: tpu7x:2x2x1
jax: 0.10.0
libtpu: 0.0.40
codegen_flags: <defaults>
</compile_context>

<pallas_src>
import functools

import jax
import jax.numpy as jnp
from jax.experimental import pallas as pl
from jax.experimental.pallas import tpu as pltpu

# ----------------------------- config ---------------------------------------
BATCH = 8            # n
IN_DIM = 32          # raw "audio" feature dim fed to the encoder
FEAT_DIM = 32        # queue_feature_dim (pre-projection)
PROJ_DIM = 128       # self.projection_dim
QUEUE_SIZE = 128     # queue_size (divisible by BATCH; lane-dense l_neg)
MOMENTUM = 0.999
TEMPERATURE = 0.07
MLP = True           # mlp=True branch of the module
RETURN_Q = False

_VMEM = pl.BlockSpec(memory_space=pltpu.MemorySpace.VMEM)
_SMEM = pl.BlockSpec(memory_space=pltpu.MemorySpace.SMEM)
_ANY = pl.BlockSpec(memory_space=pl.ANY)


# ----------------------------- fused Pallas kernel ---------------------------
def _moco_fused_kernel(
    # ---- inputs ----
    ptr_ref,                                    # SMEM (1,) int32 queue_ptr
    xq_ref, xk_ref,                             # (N, IN_DIM)
    wqe_ref, bqe_ref,                           # encoder_q
    wq1_ref, bq1_ref, wq2_ref, bq2_ref,         # projection_head_q
    wke_ref, bke_ref,                           # encoder_k (pre-EMA)
    wk1_ref, bk1_ref, wk2_ref, bk2_ref,         # projection_head_k (pre-EMA)
    queue_hbm_ref,                              # ANY (QUEUE_SIZE, C) in HBM
    # ---- outputs ----
    lpos_ref,                                   # (N, 1)
    lneg_ref,                                   # (N, QUEUE_SIZE)
    qraw_ref,                                   # (N, C)  q before normalize
    nwke_ref, nbke_ref,                         # updated encoder_k (aliased)
    nwk1_ref, nbk1_ref, nwk2_ref, nbk2_ref,     # updated head_k (aliased)
    queue_out_ref,                              # ANY, aliased to queue input
    # ---- scratch ----
    queue_vmem,                                 # VMEM (QUEUE_SIZE, C)
    kn_vmem,                                    # VMEM (N, C)
    dma_sems,                                   # DMA semaphores (2,)
    *, inv_temp, momentum,
):
    n = kn_vmem.shape[0]

    # Kick off the queue HBM -> VMEM fetch; it overlaps with the encoder math.
    fetch = pltpu.make_async_copy(queue_hbm_ref, queue_vmem, dma_sems.at[0])
    fetch.start()

    # ---- momentum_update(): EMA of the key encoder / key head (VPU) --------
    m = momentum
    om = 1.0 - momentum
    wke = wke_ref[...] * m + wqe_ref[...] * om
    bke = bke_ref[...] * m + bqe_ref[...] * om
    wk1 = wk1_ref[...] * m + wq1_ref[...] * om
    bk1 = bk1_ref[...] * m + bq1_ref[...] * om
    wk2 = wk2_ref[...] * m + wq2_ref[...] * om
    bk2 = bk2_ref[...] * m + bq2_ref[...] * om
    nwke_ref[...] = wke
    nbke_ref[...] = bke
    nwk1_ref[...] = wk1
    nbk1_ref[...] = bk1
    nwk2_ref[...] = wk2
    nbk2_ref[...] = bk2

    # ---- query branch: encoder Linear -> fc1 -> ReLU -> fc2 ----------------
    hq = jnp.dot(xq_ref[...], wqe_ref[...],
                 preferred_element_type=jnp.float32) + bqe_ref[...]
    hq = jnp.dot(hq, wq1_ref[...],
                 preferred_element_type=jnp.float32) + bq1_ref[...]
    hq = jnp.maximum(hq, 0.0)
    q = jnp.dot(hq, wq2_ref[...],
                preferred_element_type=jnp.float32) + bq2_ref[...]
    qraw_ref[...] = q

    # ---- key branch (uses EMA-updated weights, as in the module) -----------
    hk = jnp.dot(xk_ref[...], wke, preferred_element_type=jnp.float32) + bke
    hk = jnp.dot(hk, wk1, preferred_element_type=jnp.float32) + bk1
    hk = jnp.maximum(hk, 0.0)
    k = jnp.dot(hk, wk2, preferred_element_type=jnp.float32) + bk2

    # ---- F.normalize(dim=1): x / max(||x||, eps) ----------------------------
    eps = 1e-12
    qn = q / jnp.maximum(jnp.sqrt(jnp.sum(q * q, axis=1, keepdims=True)), eps)
    kn = k / jnp.maximum(jnp.sqrt(jnp.sum(k * k, axis=1, keepdims=True)), eps)
    kn_vmem[...] = kn

    # ---- l_pos = einsum('nc,nc->n')[:, None] / T ----------------------------
    lpos_ref[...] = jnp.sum(qn * kn, axis=1, keepdims=True) * inv_temp

    # ---- l_neg = qn @ queue.T / T  (nt matmul, no transpose materialized) ---
    fetch.wait()
    l_neg = jax.lax.dot_general(
        qn, queue_vmem[...],
        dimension_numbers=(((1,), (1,)), ((), ())),
        preferred_element_type=jnp.float32)
    lneg_ref[...] = l_neg * inv_temp

    # ---- dequeue_and_enqueue(): in-place write of N rows at queue_ptr -------
    ptr = pl.multiple_of(ptr_ref[0], n)
    enqueue = pltpu.make_async_copy(
        kn_vmem, queue_out_ref.at[pl.ds(ptr, n)], dma_sems.at[1])
    enqueue.start()
    enqueue.wait()


def _build_fused_call():
    c = PROJ_DIM if MLP else FEAT_DIM
    kern = functools.partial(
        _moco_fused_kernel, inv_temp=1.0 / TEMPERATURE, momentum=MOMENTUM)
    out_shape = (
        jax.ShapeDtypeStruct((BATCH, 1), jnp.float32),            # l_pos
        jax.ShapeDtypeStruct((BATCH, QUEUE_SIZE), jnp.float32),   # l_neg
        jax.ShapeDtypeStruct((BATCH, c), jnp.float32),            # q (raw)
        jax.ShapeDtypeStruct((IN_DIM, FEAT_DIM), jnp.float32),    # new enc_k.w
        jax.ShapeDtypeStruct((1, FEAT_DIM), jnp.float32),         # new enc_k.b
        jax.ShapeDtypeStruct((FEAT_DIM, FEAT_DIM), jnp.float32),  # new fc1.w
        jax.ShapeDtypeStruct((1, FEAT_DIM), jnp.float32),         # new fc1.b
        jax.ShapeDtypeStruct((FEAT_DIM, PROJ_DIM), jnp.float32),  # new fc2.w
        jax.ShapeDtypeStruct((1, PROJ_DIM), jnp.float32),         # new fc2.b
        jax.ShapeDtypeStruct((QUEUE_SIZE, c), jnp.float32),       # new queue
    )
    return pl.pallas_call(
        kern,
        out_shape=out_shape,
        in_specs=[_SMEM] + [_VMEM] * 14 + [_ANY],
        out_specs=(_VMEM,) * 9 + (_ANY,),
        scratch_shapes=[
            pltpu.VMEM((QUEUE_SIZE, c), jnp.float32),   # queue copy for matmul
            pltpu.VMEM((BATCH, c), jnp.float32),        # normalized keys stage
            pltpu.SemaphoreType.DMA((2,)),
        ],
        # enc_k / head_k weights and the queue are updated in place.
        input_output_aliases={9: 3, 10: 4, 11: 5, 12: 6, 13: 7, 14: 8, 15: 9},
    )


_MOCO_FUSED = _build_fused_call()


# ----------------------------- parameter setup -------------------------------
def _linear_init(key, din, dout):
    # Weights stored pre-transposed as (Din, Dout)  (== torch weight.T).
    kw, kb = jax.random.split(key)
    bound = 1.0 / float(din) ** 0.5
    w = jax.random.uniform(kw, (din, dout), jnp.float32, -bound, bound)
    b = jax.random.uniform(kb, (1, dout), jnp.float32, -bound, bound)
    return {"w": w, "b": b}


def init_moco_params(key):
    k_enc, k_fc1, k_fc2, k_queue = jax.random.split(key, 4)
    enc_q = _linear_init(k_enc, IN_DIM, FEAT_DIM)
    # encoder_k.load_state_dict(encoder_q.state_dict())  -> identical copy
    enc_k = jax.tree_util.tree_map(jnp.copy, enc_q)
    proj_q = {"fc1": _linear_init(k_fc1, FEAT_DIM, FEAT_DIM),
              "fc2": _linear_init(k_fc2, FEAT_DIM, PROJ_DIM)}
    proj_k = jax.tree_util.tree_map(jnp.copy, proj_q)
    qfd = PROJ_DIM if MLP else FEAT_DIM
    queue = jax.random.normal(k_queue, (QUEUE_SIZE, qfd), jnp.float32)
    queue = queue / jnp.maximum(
        jnp.linalg.norm(queue, axis=1, keepdims=True), 1e-12)
    return {"enc_q": enc_q, "enc_k": enc_k,
            "proj_q": proj_q, "proj_k": proj_k,
            "queue": queue, "queue_ptr": jnp.int32(0)}


# ----------------------------- forward ---------------------------------------
@jax.jit
def moco_forward(params, x_q, x_k):
    n = x_q.shape[0]
    ptr = jnp.reshape(params["queue_ptr"].astype(jnp.int32), (1,))
    (l_pos, l_neg, q_raw,
     wke, bke, wk1, bk1, wk2, bk2, new_queue) = _MOCO_FUSED(
        ptr, x_q, x_k,
        params["enc_q"]["w"], params["enc_q"]["b"],
        params["proj_q"]["fc1"]["w"], params["proj_q"]["fc1"]["b"],
        params["proj_q"]["fc2"]["w"], params["proj_q"]["fc2"]["b"],
        params["enc_k"]["w"], params["enc_k"]["b"],
        params["proj_k"]["fc1"]["w"], params["proj_k"]["fc1"]["b"],
        params["proj_k"]["fc2"]["w"], params["proj_k"]["fc2"]["b"],
        params["queue"],
    )
    # Wrapper-side concat keeps the kernel's stores lane-dense.
    logits = jnp.concatenate([l_pos, l_neg], axis=1)
    labels = jnp.zeros((n,), dtype=jnp.int32)   # torch.long -> int32 on TPU

    new_state = {
        "enc_q": params["enc_q"],
        "proj_q": params["proj_q"],
        "enc_k": {"w": wke, "b": bke},
        "proj_k": {"fc1": {"w": wk1, "b": bk1}, "fc2": {"w": wk2, "b": bk2}},
        "queue": new_queue,
        "queue_ptr": (params["queue_ptr"] + n) % QUEUE_SIZE,
    }
    if RETURN_Q:
        return (logits, labels, q_raw), new_state
    return (logits, labels), new_state


# ----------------------------- plain-JAX reference ---------------------------
def _moco_reference(params, x_q, x_k):
    hp = jax.lax.Precision.HIGHEST

    def dot(a, b):
        return jnp.dot(a, b, precision=hp)

    q = dot(x_q, params["enc_q"]["w"]) + params["enc_q"]["b"]
    q = dot(q, params["proj_q"]["fc1"]["w"]) + params["proj_q"]["fc1"]["b"]
    q = jnp.maximum(q, 0.0)
    q = dot(q, params["proj_q"]["fc2"]["w"]) + params["proj_q"]["fc2"]["b"]

    m = MOMENTUM
    ek = jax.tree_util.tree_map(
        lambda a, b: a * m + b * (1.0 - m), params["enc_k"], params["enc_q"])
    pk = jax.tree_util.tree_map(
        lambda a, b: a * m + b * (1.0 - m), params["proj_k"], params["proj_q"])
    k = dot(x_k, ek["w"]) + ek["b"]
    k = dot(k, pk["fc1"]["w"]) + pk["fc1"]["b"]
    k = jnp.maximum(k, 0.0)
    k = dot(k, pk["fc2"]["w"]) + pk["fc2"]["b"]

    qn = q / jnp.maximum(jnp.linalg.norm(q, axis=1, keepdims=True), 1e-12)
    kn = k / jnp.maximum(jnp.linalg.norm(k, axis=1, keepdims=True), 1e-12)
    l_pos = jnp.sum(qn * kn, axis=1, keepdims=True)
    l_neg = dot(qn, params["queue"].T)
    logits = jnp.concatenate([l_pos, l_neg], axis=1) / TEMPERATURE
    new_queue = jax.lax.dynamic_update_slice(
        params["queue"], kn, (params["queue_ptr"], jnp.int32(0)))
    return logits, new_queue


# ----------------------------- main ------------------------------------------
if __name__ == "__main__":
    root = jax.random.PRNGKey(0)
    k_params, k_xq, k_xk = jax.random.split(root, 3)

    params = init_moco_params(k_params)
    x_q = jax.random.normal(k_xq, (BATCH, IN_DIM), jnp.float32)
    x_k = jax.random.normal(k_xk, (BATCH, IN_DIM), jnp.float32)

    (logits, labels), new_state = moco_forward(params, x_q, x_k)
    jax.block_until_ready((logits, labels, new_state["queue"]))

    # shape / state checks
    assert logits.shape == (BATCH, 1 + QUEUE_SIZE)
    assert labels.shape == (BATCH,)
    assert new_state["queue"].shape == (QUEUE_SIZE, PROJ_DIM if MLP else FEAT_DIM)
    assert int(new_state["queue_ptr"]) == BATCH % QUEUE_SIZE

    # numeric smoke-check vs. plain JAX (loose tolerance for MXU f32 path)
    ref_logits, ref_queue = _moco_reference(params, x_q, x_k)
    assert bool(jnp.all(jnp.isfinite(logits)))
    assert bool(jnp.allclose(logits, ref_logits, atol=1e-1, rtol=1e-1))
    assert bool(jnp.allclose(new_state["queue"], ref_queue, atol=2e-2, rtol=2e-2))

    print("KERNEL_OK")
</pallas_src>

<mosaic_0001>
module attributes {stable_mosaic.version = 11 : i64} {
  func.func @_moco_fused_kernel(%arg0: memref<1xi32, #tpu.memory_space<smem>>, %arg1: memref<8x32xf32, #tpu.memory_space<vmem>>, %arg2: memref<8x32xf32, #tpu.memory_space<vmem>>, %arg3: memref<32x32xf32, #tpu.memory_space<vmem>>, %arg4: memref<1x32xf32, #tpu.memory_space<vmem>>, %arg5: memref<32x32xf32, #tpu.memory_space<vmem>>, %arg6: memref<1x32xf32, #tpu.memory_space<vmem>>, %arg7: memref<32x128xf32, #tpu.memory_space<vmem>>, %arg8: memref<1x128xf32, #tpu.memory_space<vmem>>, %arg9: memref<32x32xf32, #tpu.memory_space<vmem>>, %arg10: memref<1x32xf32, #tpu.memory_space<vmem>>, %arg11: memref<32x32xf32, #tpu.memory_space<vmem>>, %arg12: memref<1x32xf32, #tpu.memory_space<vmem>>, %arg13: memref<32x128xf32, #tpu.memory_space<vmem>>, %arg14: memref<1x128xf32, #tpu.memory_space<vmem>>, %arg15: memref<128x128xf32, #tpu.memory_space<any>>, %arg16: memref<8x1xf32, #tpu.memory_space<vmem>>, %arg17: memref<8x128xf32, #tpu.memory_space<vmem>>, %arg18: memref<8x128xf32, #tpu.memory_space<vmem>>, %arg19: memref<32x32xf32, #tpu.memory_space<vmem>>, %arg20: memref<1x32xf32, #tpu.memory_space<vmem>>, %arg21: memref<32x32xf32, #tpu.memory_space<vmem>>, %arg22: memref<1x32xf32, #tpu.memory_space<vmem>>, %arg23: memref<32x128xf32, #tpu.memory_space<vmem>>, %arg24: memref<1x128xf32, #tpu.memory_space<vmem>>, %arg25: memref<128x128xf32, #tpu.memory_space<any>>, %arg26: memref<128x128xf32, #tpu.memory_space<vmem>>, %arg27: memref<8x128xf32, #tpu.memory_space<vmem>>, %arg28: memref<2x!tpu.dma_semaphore, #tpu.memory_space<semaphore_mem>>) attributes {dimension_semantics = [], scalar_prefetch = 0 : i64, scratch_operands = 3 : i64, tpu.core_type = #tpu.core_type<tc>} {
    %c0_i32 = arith.constant 0 : i32
    %0 = tpu.memref_slice %arg28[%c0_i32] : memref<2x!tpu.dma_semaphore, #tpu.memory_space<semaphore_mem>> -> memref<1x!tpu.dma_semaphore, #tpu.memory_space<semaphore_mem>>
    %1 = tpu.memref_squeeze %0 : memref<1x!tpu.dma_semaphore, #tpu.memory_space<semaphore_mem>> -> memref<!tpu.dma_semaphore, #tpu.memory_space<semaphore_mem>>
    tpu.enqueue_dma source(%arg15 : memref<128x128xf32, #tpu.memory_space<any>>) target(%arg26 : memref<128x128xf32, #tpu.memory_space<vmem>>) target_semaphore(%1 : memref<!tpu.dma_semaphore, #tpu.memory_space<semaphore_mem>>)
    %c0 = arith.constant 0 : index
    %c0_0 = arith.constant 0 : index
    %2 = vector.load %arg9[%c0, %c0_0] : memref<32x32xf32, #tpu.memory_space<vmem>>, vector<32x32xf32>
    %cst = arith.constant 9.990000e-01 : f32
    %3 = vector.broadcast %cst : f32 to vector<32x32xf32>
    %4 = arith.mulf %2, %3 : vector<32x32xf32>
    %c0_1 = arith.constant 0 : index
    %c0_2 = arith.constant 0 : index
    %5 = vector.load %arg3[%c0_1, %c0_2] : memref<32x32xf32, #tpu.memory_space<vmem>>, vector<32x32xf32>
    %cst_3 = arith.constant 1.000000e-03 : f32
    %6 = vector.broadcast %cst_3 : f32 to vector<32x32xf32>
    %7 = arith.mulf %5, %6 : vector<32x32xf32>
    %8 = arith.addf %4, %7 : vector<32x32xf32>
    %c0_4 = arith.constant 0 : index
    %c0_5 = arith.constant 0 : index
    %9 = vector.load %arg10[%c0_4, %c0_5] : memref<1x32xf32, #tpu.memory_space<vmem>>, vector<1x32xf32>
    %cst_6 = arith.constant 9.990000e-01 : f32
    %10 = vector.broadcast %cst_6 : f32 to vector<1x32xf32>
    %11 = arith.mulf %9, %10 : vector<1x32xf32>
    %c0_7 = arith.constant 0 : index
    %c0_8 = arith.constant 0 : index
    %12 = vector.load %arg4[%c0_7, %c0_8] : memref<1x32xf32, #tpu.memory_space<vmem>>, vector<1x32xf32>
    %cst_9 = arith.constant 1.000000e-03 : f32
    %13 = vector.broadcast %cst_9 : f32 to vector<1x32xf32>
    %14 = arith.mulf %12, %13 : vector<1x32xf32>
    %15 = arith.addf %11, %14 : vector<1x32xf32>
    %c0_10 = arith.constant 0 : index
    %c0_11 = arith.constant 0 : index
    %16 = vector.load %arg11[%c0_10, %c0_11] : memref<32x32xf32, #tpu.memory_space<vmem>>, vector<32x32xf32>
    %cst_12 = arith.constant 9.990000e-01 : f32
    %17 = vector.broadcast %cst_12 : f32 to vector<32x32xf32>
    %18 = arith.mulf %16, %17 : vector<32x32xf32>
    %c0_13 = arith.constant 0 : index
    %c0_14 = arith.constant 0 : index
    %19 = vector.load %arg5[%c0_13, %c0_14] : memref<32x32xf32, #tpu.memory_space<vmem>>, vector<32x32xf32>
    %cst_15 = arith.constant 1.000000e-03 : f32
    %20 = vector.broadcast %cst_15 : f32 to vector<32x32xf32>
    %21 = arith.mulf %19, %20 : vector<32x32xf32>
    %22 = arith.addf %18, %21 : vector<32x32xf32>
    %c0_16 = arith.constant 0 : index
    %c0_17 = arith.constant 0 : index
    %23 = vector.load %arg12[%c0_16, %c0_17] : memref<1x32xf32, #tpu.memory_space<vmem>>, vector<1x32xf32>
    %cst_18 = arith.constant 9.990000e-01 : f32
    %24 = vector.broadcast %cst_18 : f32 to vector<1x32xf32>
    %25 = arith.mulf %23, %24 : vector<1x32xf32>
    %c0_19 = arith.constant 0 : index
    %c0_20 = arith.constant 0 : index
    %26 = vector.load %arg6[%c0_19, %c0_20] : memref<1x32xf32, #tpu.memory_space<vmem>>, vector<1x32xf32>
    %cst_21 = arith.constant 1.000000e-03 : f32
    %27 = vector.broadcast %cst_21 : f32 to vector<1x32xf32>
    %28 = arith.mulf %26, %27 : vector<1x32xf32>
    %29 = arith.addf %25, %28 : vector<1x32xf32>
    %c0_22 = arith.constant 0 : index
    %c0_23 = arith.constant 0 : index
    %30 = vector.load %arg13[%c0_22, %c0_23] : memref<32x128xf32, #tpu.memory_space<vmem>>, vector<32x128xf32>
    %cst_24 = arith.constant 9.990000e-01 : f32
    %31 = vector.broadcast %cst_24 : f32 to vector<32x128xf32>
    %32 = arith.mulf %30, %31 : vector<32x128xf32>
    %c0_25 = arith.constant 0 : index
    %c0_26 = arith.constant 0 : index
    %33 = vector.load %arg7[%c0_25, %c0_26] : memref<32x128xf32, #tpu.memory_space<vmem>>, vector<32x128xf32>
    %cst_27 = arith.constant 1.000000e-03 : f32
    %34 = vector.broadcast %cst_27 : f32 to vector<32x128xf32>
    %35 = arith.mulf %33, %34 : vector<32x128xf32>
    %36 = arith.addf %32, %35 : vector<32x128xf32>
    %c0_28 = arith.constant 0 : index
    %c0_29 = arith.constant 0 : index
    %37 = vector.load %arg14[%c0_28, %c0_29] : memref<1x128xf32, #tpu.memory_space<vmem>>, vector<1x128xf32>
    %cst_30 = arith.constant 9.990000e-01 : f32
    %38 = vector.broadcast %cst_30 : f32 to vector<1x128xf32>
    %39 = arith.mulf %37, %38 : vector<1x128xf32>
    %c0_31 = arith.constant 0 : index
    %c0_32 = arith.constant 0 : index
    %40 = vector.load %arg8[%c0_31, %c0_32] : memref<1x128xf32, #tpu.memory_space<vmem>>, vector<1x128xf32>
    %cst_33 = arith.constant 1.000000e-03 : f32
    %41 = vector.broadcast %cst_33 : f32 to vector<1x128xf32>
    %42 = arith.mulf %40, %41 : vector<1x128xf32>
    %43 = arith.addf %39, %42 : vector<1x128xf32>
    %c0_34 = arith.constant 0 : index
    %c0_35 = arith.constant 0 : index
    %44 = vector.load %arg19[%c0_34, %c0_35] : memref<32x32xf32, #tpu.memory_space<vmem>>, vector<32x32xf32>
    tpu.vector_store %arg19[%c0_34, %c0_35], %8 {strides = array<i32>} : memref<32x32xf32, #tpu.memory_space<vmem>>, vector<32x32xf32>,
    %c0_36 = arith.constant 0 : index
    %c0_37 = arith.constant 0 : index
    %45 = vector.load %arg20[%c0_36, %c0_37] : memref<1x32xf32, #tpu.memory_space<vmem>>, vector<1x32xf32>
    tpu.vector_store %arg20[%c0_36, %c0_37], %15 {strides = array<i32>} : memref<1x32xf32, #tpu.memory_space<vmem>>, vector<1x32xf32>,
    %c0_38 = arith.constant 0 : index
    %c0_39 = arith.constant 0 : index
    %46 = vector.load %arg21[%c0_38, %c0_39] : memref<32x32xf32, #tpu.memory_space<vmem>>, vector<32x32xf32>
    tpu.vector_store %arg21[%c0_38, %c0_39], %22 {strides = array<i32>} : memref<32x32xf32, #tpu.memory_space<vmem>>, vector<32x32xf32>,
    %c0_40 = arith.constant 0 : index
    %c0_41 = arith.constant 0 : index
    %47 = vector.load %arg22[%c0_40, %c0_41] : memref<1x32xf32, #tpu.memory_space<vmem>>, vector<1x32xf32>
    tpu.vector_store %arg22[%c0_40, %c0_41], %29 {strides = array<i32>} : memref<1x32xf32, #tpu.memory_space<vmem>>, vector<1x32xf32>,
    %c0_42 = arith.constant 0 : index
    %c0_43 = arith.constant 0 : index
    %48 = vector.load %arg23[%c0_42, %c0_43] : memref<32x128xf32, #tpu.memory_space<vmem>>, vector<32x128xf32>
    tpu.vector_store %arg23[%c0_42, %c0_43], %36 {strides = array<i32>} : memref<32x128xf32, #tpu.memory_space<vmem>>, vector<32x128xf32>,
    %c0_44 = arith.constant 0 : index
    %c0_45 = arith.constant 0 : index
    %49 = vector.load %arg24[%c0_44, %c0_45] : memref<1x128xf32, #tpu.memory_space<vmem>>, vector<1x128xf32>
    tpu.vector_store %arg24[%c0_44, %c0_45], %43 {strides = array<i32>} : memref<1x128xf32, #tpu.memory_space<vmem>>, vector<1x128xf32>,
    %c0_46 = arith.constant 0 : index
    %c0_47 = arith.constant 0 : index
    %50 = vector.load %arg1[%c0_46, %c0_47] : memref<8x32xf32, #tpu.memory_space<vmem>>, vector<8x32xf32>
    %c0_48 = arith.constant 0 : index
    %c0_49 = arith.constant 0 : index
    %51 = vector.load %arg3[%c0_48, %c0_49] : memref<32x32xf32, #tpu.memory_space<vmem>>, vector<32x32xf32>
    %cst_50 = arith.constant dense<0.000000e+00> : vector<8x32xf32>
    %52 = tpu.matmul %50, %51, %cst_50 {dimension_numbers = #tpu.dot_dimension_numbers<[1], [0], [0], [1], [0, 0, 1, 1], [], []>} : vector<8x32xf32>, vector<32x32xf32>, vector<8x32xf32> -> vector<8x32xf32>
    %c0_51 = arith.constant 0 : index
    %c0_52 = arith.constant 0 : index
    %53 = vector.load %arg4[%c0_51, %c0_52] : memref<1x32xf32, #tpu.memory_space<vmem>>, vector<1x32xf32>
    %54 = vector.broadcast %53 : vector<1x32xf32> to vector<8x32xf32>
    %55 = arith.addf %52, %54 : vector<8x32xf32>
    %c0_53 = arith.constant 0 : index
    %c0_54 = arith.constant 0 : index
    %56 = vector.load %arg5[%c0_53, %c0_54] : memref<32x32xf32, #tpu.memory_space<vmem>>, vector<32x32xf32>
    %cst_55 = arith.constant dense<0.000000e+00> : vector<8x32xf32>
    %57 = tpu.matmul %55, %56, %cst_55 {dimension_numbers = #tpu.dot_dimension_numbers<[1], [0], [0], [1], [0, 0, 1, 1], [], []>} : vector<8x32xf32>, vector<32x32xf32>, vector<8x32xf32> -> vector<8x32xf32>
    %c0_56 = arith.constant 0 : index
    %c0_57 = arith.constant 0 : index
    %58 = vector.load %arg6[%c0_56, %c0_57] : memref<1x32xf32, #tpu.memory_space<vmem>>, vector<1x32xf32>
    %59 = vector.broadcast %58 : vector<1x32xf32> to vector<8x32xf32>
    %60 = arith.addf %57, %59 : vector<8x32xf32>
    %cst_58 = arith.constant 0.000000e+00 : f32
    %61 = vector.broadcast %cst_58 : f32 to vector<8x32xf32>
    %62 = arith.maximumf %60, %61 : vector<8x32xf32>
    %c0_59 = arith.constant 0 : index
    %c0_60 = arith.constant 0 : index
    %63 = vector.load %arg7[%c0_59, %c0_60] : memref<32x128xf32, #tpu.memory_space<vmem>>, vector<32x128xf32>
    %cst_61 = arith.constant dense<0.000000e+00> : vector<8x128xf32>
    %64 = tpu.matmul %62, %63, %cst_61 {dimension_numbers = #tpu.dot_dimension_numbers<[1], [0], [0], [1], [0, 0, 1, 1], [], []>} : vector<8x32xf32>, vector<32x128xf32>, vector<8x128xf32> -> vector<8x128xf32>
    %c0_62 = arith.constant 0 : index
    %c0_63 = arith.constant 0 : index
    %65 = vector.load %arg8[%c0_62, %c0_63] : memref<1x128xf32, #tpu.memory_space<vmem>>, vector<1x128xf32>
    %66 = vector.broadcast %65 : vector<1x128xf32> to vector<8x128xf32>
    %67 = arith.addf %64, %66 : vector<8x128xf32>
    %c0_64 = arith.constant 0 : index
    %c0_65 = arith.constant 0 : index
    %68 = vector.load %arg18[%c0_64, %c0_65] : memref<8x128xf32, #tpu.memory_space<vmem>>, vector<8x128xf32>
    tpu.vector_store %arg18[%c0_64, %c0_65], %67 {strides = array<i32>} : memref<8x128xf32, #tpu.memory_space<vmem>>, vector<8x128xf32>,
    %c0_66 = arith.constant 0 : index
    %c0_67 = arith.constant 0 : index
    %69 = vector.load %arg2[%c0_66, %c0_67] : memref<8x32xf32, #tpu.memory_space<vmem>>, vector<8x32xf32>
    %cst_68 = arith.constant dense<0.000000e+00> : vector<8x32xf32>
    %70 = tpu.matmul %69, %8, %cst_68 {dimension_numbers = #tpu.dot_dimension_numbers<[1], [0], [0], [1], [0, 0, 1, 1], [], []>} : vector<8x32xf32>, vector<32x32xf32>, vector<8x32xf32> -> vector<8x32xf32>
    %71 = vector.broadcast %15 : vector<1x32xf32> to vector<8x32xf32>
    %72 = arith.addf %70, %71 : vector<8x32xf32>
    %cst_69 = arith.constant dense<0.000000e+00> : vector<8x32xf32>
    %73 = tpu.matmul %72, %22, %cst_69 {dimension_numbers = #tpu.dot_dimension_numbers<[1], [0], [0], [1], [0, 0, 1, 1], [], []>} : vector<8x32xf32>, vector<32x32xf32>, vector<8x32xf32> -> vector<8x32xf32>
    %74 = vector.broadcast %29 : vector<1x32xf32> to vector<8x32xf32>
    %75 = arith.addf %73, %74 : vector<8x32xf32>
    %cst_70 = arith.constant 0.000000e+00 : f32
    %76 = vector.broadcast %cst_70 : f32 to vector<8x32xf32>
    %77 = arith.maximumf %75, %76 : vector<8x32xf32>
    %cst_71 = arith.constant dense<0.000000e+00> : vector<8x128xf32>
    %78 = tpu.matmul %77, %36, %cst_71 {dimension_numbers = #tpu.dot_dimension_numbers<[1], [0], [0], [1], [0, 0, 1, 1], [], []>} : vector<8x32xf32>, vector<32x128xf32>, vector<8x128xf32> -> vector<8x128xf32>
    %79 = vector.broadcast %43 : vector<1x128xf32> to vector<8x128xf32>
    %80 = arith.addf %78, %79 : vector<8x128xf32>
    %81 = arith.mulf %67, %67 : vector<8x128xf32>
    %cst_72 = arith.constant dense<0.000000e+00> : vector<8xf32>
    %82 = vector.multi_reduction <add>, %81, %cst_72 [1] : vector<8x128xf32> to vector<8xf32>
    %83 = vector.shape_cast %82 : vector<8xf32> to vector<8x1xf32>
    %84 = math.sqrt %83 : vector<8x1xf32>
    %cst_73 = arith.constant 9.99999996E-13 : f32
    %85 = vector.broadcast %cst_73 : f32 to vector<8x1xf32>
    %86 = arith.maximumf %84, %85 : vector<8x1xf32>
    %87 = vector.broadcast %86 : vector<8x1xf32> to vector<8x128xf32>
    %88 = arith.divf %67, %87 : vector<8x128xf32>
    %89 = arith.mulf %80, %80 : vector<8x128xf32>
    %cst_74 = arith.constant dense<0.000000e+00> : vector<8xf32>
    %90 = vector.multi_reduction <add>, %89, %cst_74 [1] : vector<8x128xf32> to vector<8xf32>
    %91 = vector.shape_cast %90 : vector<8xf32> to vector<8x1xf32>
    %92 = math.sqrt %91 : vector<8x1xf32>
    %cst_75 = arith.constant 9.99999996E-13 : f32
    %93 = vector.broadcast %cst_75 : f32 to vector<8x1xf32>
    %94 = arith.maximumf %92, %93 : vector<8x1xf32>
    %95 = vector.broadcast %94 : vector<8x1xf32> to vector<8x128xf32>
    %96 = arith.divf %80, %95 : vector<8x128xf32>
    %c0_76 = arith.constant 0 : index
    %c0_77 = arith.constant 0 : index
    %97 = vector.load %arg27[%c0_76, %c0_77] : memref<8x128xf32, #tpu.memory_space<vmem>>, vector<8x128xf32>
    tpu.vector_store %arg27[%c0_76, %c0_77], %96 {strides = array<i32>} : memref<8x128xf32, #tpu.memory_space<vmem>>, vector<8x128xf32>,
    %98 = arith.mulf %88, %96 : vector<8x128xf32>
    %cst_78 = arith.constant dense<0.000000e+00> : vector<8xf32>
    %99 = vector.multi_reduction <add>, %98, %cst_78 [1] : vector<8x128xf32> to vector<8xf32>
    %100 = vector.shape_cast %99 : vector<8xf32> to vector<8x1xf32>
    %cst_79 = arith.constant 14.2857141 : f32
    %101 = vector.broadcast %cst_79 : f32 to vector<8x1xf32>
    %102 = arith.mulf %100, %101 : vector<8x1xf32>
    %c0_80 = arith.constant 0 : index
    %c0_81 = arith.constant 0 : index
    %103 = vector.load %arg16[%c0_80, %c0_81] : memref<8x1xf32, #tpu.memory_space<vmem>>, vector<8x1xf32>
    tpu.vector_store %arg16[%c0_80, %c0_81], %102 {strides = array<i32>} : memref<8x1xf32, #tpu.memory_space<vmem>>, vector<8x1xf32>,
    %c0_i32_82 = arith.constant 0 : i32
    %104 = tpu.memref_slice %arg28[%c0_i32_82] : memref<2x!tpu.dma_semaphore, #tpu.memory_space<semaphore_mem>> -> memref<1x!tpu.dma_semaphore, #tpu.memory_space<semaphore_mem>>
    %105 = tpu.memref_squeeze %104 : memref<1x!tpu.dma_semaphore, #tpu.memory_space<semaphore_mem>> -> memref<!tpu.dma_semaphore, #tpu.memory_space<semaphore_mem>>
    tpu.wait_dma2 semaphore(%105 : memref<!tpu.dma_semaphore, #tpu.memory_space<semaphore_mem>>) src(%arg15 : memref<128x128xf32, #tpu.memory_space<any>>) dst(%arg26 : memref<128x128xf32, #tpu.memory_space<vmem>>)
    %c0_83 = arith.constant 0 : index
    %c0_84 = arith.constant 0 : index
    %106 = vector.load %arg26[%c0_83, %c0_84] : memref<128x128xf32, #tpu.memory_space<vmem>>, vector<128x128xf32>
    %cst_85 = arith.constant dense<0.000000e+00> : vector<8x128xf32>
    %107 = tpu.matmul %88, %106, %cst_85 {dimension_numbers = #tpu.dot_dimension_numbers<[1], [1], [0], [0], [0, 0, 1, 0], [], []>} : vector<8x128xf32>, vector<128x128xf32>, vector<8x128xf32> -> vector<8x128xf32>
    %cst_86 = arith.constant 14.2857141 : f32
    %108 = vector.broadcast %cst_86 : f32 to vector<8x128xf32>
    %109 = arith.mulf %107, %108 : vector<8x128xf32>
    %c0_87 = arith.constant 0 : index
    %c0_88 = arith.constant 0 : index
    %110 = vector.load %arg17[%c0_87, %c0_88] : memref<8x128xf32, #tpu.memory_space<vmem>>, vector<8x128xf32>
    tpu.vector_store %arg17[%c0_87, %c0_88], %109 {strides = array<i32>} : memref<8x128xf32, #tpu.memory_space<vmem>>, vector<8x128xf32>,
    %c0_89 = arith.constant 0 : index
    %111 = memref.load %arg0[%c0_89] : memref<1xi32, #tpu.memory_space<smem>>
    %112 = tpu.assume_multiple %111, 8 : i32
    %c1_i32 = arith.constant 1 : i32
    %c0_i32_90 = arith.constant 0 : i32
    %113 = tpu.memref_slice %arg25[%112, %c0_i32_90] : memref<128x128xf32, #tpu.memory_space<any>> -> memref<8x128xf32, #tpu.memory_space<any>>
    %114 = tpu.memref_slice %arg28[%c1_i32] : memref<2x!tpu.dma_semaphore, #tpu.memory_space<semaphore_mem>> -> memref<1x!tpu.dma_semaphore, #tpu.memory_space<semaphore_mem>>
    %115 = tpu.memref_squeeze %114 : memref<1x!tpu.dma_semaphore, #tpu.memory_space<semaphore_mem>> -> memref<!tpu.dma_semaphore, #tpu.memory_space<semaphore_mem>>
    tpu.enqueue_dma source(%arg27 : memref<8x128xf32, #tpu.memory_space<vmem>>) target(%113 : memref<8x128xf32, #tpu.memory_space<any>>) target_semaphore(%115 : memref<!tpu.dma_semaphore, #tpu.memory_space<semaphore_mem>>)
    %c1_i32_91 = arith.constant 1 : i32
    %c0_i32_92 = arith.constant 0 : i32
    %116 = tpu.memref_slice %arg25[%112, %c0_i32_92] : memref<128x128xf32, #tpu.memory_space<any>> -> memref<8x128xf32, #tpu.memory_space<any>>
    %117 = tpu.memref_slice %arg28[%c1_i32_91] : memref<2x!tpu.dma_semaphore, #tpu.memory_space<semaphore_mem>> -> memref<1x!tpu.dma_semaphore, #tpu.memory_space<semaphore_mem>>
    %118 = tpu.memref_squeeze %117 : memref<1x!tpu.dma_semaphore, #tpu.memory_space<semaphore_mem>> -> memref<!tpu.dma_semaphore, #tpu.memory_space<semaphore_mem>>
    tpu.wait_dma2 semaphore(%118 : memref<!tpu.dma_semaphore, #tpu.memory_space<semaphore_mem>>) src(%arg27 : memref<8x128xf32, #tpu.memory_space<vmem>>) dst(%116 : memref<8x128xf32, #tpu.memory_space<any>>)
    return
  }
}

</mosaic_0001>

<bundles_post_ra>
// kernel: moco_forward.1
= control target key start
LH: loop header
LB: loop body
LE: loop exit
PB: predicated region body
PF: predicated region fallthrough
CT: control target
= control target key end

     0   :  { %s1720_s0 = inlined_call_operand.<no memory space> [shape: s32[1], index: 0, kind: input, shape index: {}]   ;;  %s1721_s1 = inlined_call_operand.vmem [shape: f32[8,32], index: 1, kind: input, shape index: {}]   ;;  %s1722_s2 = inlined_call_operand.vmem [shape: f32[8,32], index: 2, kind: input, shape index: {}]   ;;  %s1723_s3 = inlined_call_operand.vmem [shape: f32[32,32], index: 3, kind: input, shape index: {}]   ;;  %s1724_s4 = inlined_call_operand.vmem [shape: f32[1,32], index: 4, kind: input, shape index: {}]   ;;  %s1725_s5 = inlined_call_operand.vmem [shape: f32[32,32], index: 5, kind: input, shape index: {}]   ;;  %s1726_s6 = inlined_call_operand.vmem [shape: f32[1,32], index: 6, kind: input, shape index: {}]   ;;  %s1727_s7 = inlined_call_operand.vmem [shape: f32[32,128], index: 7, kind: input, shape index: {}]   ;;  %s1728_s8 = inlined_call_operand.vmem [shape: f32[1,128], index: 8, kind: input, shape index: {}]   ;;  %s1729_s9 = inlined_call_operand.vmem [shape: f32[32,32], index: 9, kind: input, shape index: {}, may-alias: {9,19}]   ;;  %s1730_s10 = inlined_call_operand.vmem [shape: f32[1,32], index: 10, kind: input, shape index: {}, may-alias: {10,20}]   ;;  %s1731_s11 = inlined_call_operand.vmem [shape: f32[32,32], index: 11, kind: input, shape index: {}, may-alias: {11,21}]   ;;  %s1732_s12 = inlined_call_operand.vmem [shape: f32[1,32], index: 12, kind: input, shape index: {}, may-alias: {12,22}]   ;;  %s1733_s13 = inlined_call_operand.vmem [shape: f32[32,128], index: 13, kind: input, shape index: {}, may-alias: {13,23}]   ;;  %s1734_s14 = inlined_call_operand.vmem [shape: f32[1,128], index: 14, kind: input, shape index: {}, may-alias: {14,24}]   ;;  %s1735_s15 = inlined_call_operand.vmem [shape: f32[128,128], index: 15, kind: input, shape index: {}, may-alias: {15,25}]   ;;  %s1736_s16 = inlined_call_operand.vmem [shape: f32[8,1], index: 16, kind: output, shape index: {0}]   ;;  %s1737_s17 = inlined_call_operand.vmem [shape: f32[8,128], index: 17, kind: output, shape index: {1}]   ;;  %s1738_s18 = inlined_call_operand.hbm [shape: f32[8,128], index: 18, kind: output, shape index: {2}]   ;;  %s1739_s19 = inlined_call_operand.vmem [shape: f32[32,32], index: 19, kind: output, shape index: {3}, may-alias: {9,19}]   ;;  %s1740_s20 = inlined_call_operand.vmem [shape: f32[1,32], index: 20, kind: output, shape index: {4}, may-alias: {10,20}]   ;;  %s1741_s21 = inlined_call_operand.vmem [shape: f32[32,32], index: 21, kind: output, shape index: {5}, may-alias: {11,21}]   ;;  %s1742_s22 = inlined_call_operand.vmem [shape: f32[1,32], index: 22, kind: output, shape index: {6}, may-alias: {12,22}]   ;;  %s1743_s23 = inlined_call_operand.vmem [shape: f32[32,128], index: 23, kind: output, shape index: {7}, may-alias: {13,23}]   ;;  %s1744_s24 = inlined_call_operand.vmem [shape: f32[1,128], index: 24, kind: output, shape index: {8}, may-alias: {14,24}]   ;;  %s1745_s25 = inlined_call_operand.vmem [shape: f32[128,128], index: 25, kind: output, shape index: {9}, may-alias: {15,25}]  }
   0x1   :  { %1753 = sst [smem:[#allocation13_spill]] %s1720_s0 }
   0x2   :  { %1754 = sst [smem:[#allocation14_spill]] %s1721_s1 }
   0x3   :  { %1755 = sst [smem:[#allocation15_spill]] %s1722_s2 }
   0x4   :  { %1756 = sst [smem:[#allocation16_spill]] %s1723_s3 }
   0x5   :  { %1757 = sst [smem:[#allocation17_spill]] %s1724_s4 }
   0x6   :  { %1758 = sst [smem:[#allocation18_spill]] %s1725_s5 }
   0x7   :  { %1759 = sst [smem:[#allocation19_spill]] %s1726_s6 }
   0x8   :  { %1760 = sst [smem:[#allocation20_spill]] %s1727_s7 }
   0x9   :  { %1761 = sst [smem:[#allocation21_spill]] %s1728_s8 }
   0xa   :  { %1762 = sst [smem:[#allocation22_spill]] %s1729_s9 }
   0xb   :  { %32 = vsyncpa [#allocation7], 0  ;;  %v1365_v0 = vld [vmem:[%s1735_s15] sm:$0xff]  ;;  %v1370_v1 = vld [vmem:[%s1735_s15 + $0x8] sm:$0xff] }
   0xc   :  { %v1375_v2 = vld [vmem:[%s1735_s15 + $0x10] sm:$0xff]  ;;  %v1380_v3 = vld [vmem:[%s1735_s15 + $0x18] sm:$0xff]  ;;  %v1385_v4 = vld [vmem:[%s1735_s15 + $0x20] sm:$0xff] }
   0xd   :  { %v1390_v5 = vld [vmem:[%s1735_s15 + $0x28] sm:$0xff]  ;;  %v1395_v6 = vld [vmem:[%s1735_s15 + $0x30] sm:$0xff]  ;;  %v1400_v7 = vld [vmem:[%s1735_s15 + $0x38] sm:$0xff] }
   0xe   :  { %v1405_v8 = vld [vmem:[%s1735_s15 + $0x40] sm:$0xff]  ;;  %v1410_v9 = vld [vmem:[%s1735_s15 + $0x48] sm:$0xff]  ;;  %v1415_v10 = vld [vmem:[%s1735_s15 + $0x50] sm:$0xff] }
   0xf   :  { %v1420_v11 = vld [vmem:[%s1735_s15 + $0x58] sm:$0xff]  ;;  %v1425_v12 = vld [vmem:[%s1735_s15 + $0x60] sm:$0xff]  ;;  %v1430_v13 = vld [vmem:[%s1735_s15 + $0x68] sm:$0xff] }
  0x10   :  { %v1435_v14 = vld [vmem:[%s1735_s15 + $0x70] sm:$0xff]  ;;  %v1440_v15 = vld [vmem:[%s1735_s15 + $0x78] sm:$0xff] }
  0x11   :  { %134 = vsyncadd [#allocation4], 2048  ;;  %s1763_s7 = sld [smem:[#allocation16_spill]]  ;;  %v1228_v18 = vmov 0.0|0.0   ;;  %vm1229_vm0 = vmmov 0   ;;  %v1230_v22 = vmov 0.0  }
  0x12   :  { %1128 = vmatprep.subr.bf16.mxu1 %v1228_v18  ;;  %1035 = vmatprep.mubr.msk.f32.mxu1 %vm1229_vm0, %v1230_v22  ;;  %s1764_s9 = sld [smem:[#allocation18_spill]]  ;;  %vm210_vm1 = vcmask 261120   ;;  %s1765_s6 = sld [smem:[#allocation14_spill]]  ;;  %vm215_vm2 = vcmask 253952   ;;  %vm752_vm7 = vcmask 7168  }
  0x13   :  { %s1766_s27 = sld [smem:[#allocation20_spill]]  ;;  %s1768_s3 = sld [smem:[#allocation22_spill]]  ;;  %1164 = vmatprep.subr.bf16.mxu0 %v1228_v18 }
  0x14   :  { %s1769_s1 = sld [smem:[#allocation19_spill]]  ;;  %s1771_s2 = sld [smem:[#allocation21_spill]] }
  0x17   :  { %v228_v16 = vld [vmem:[%s1763_s7] sm:$0xff]  ;;  %v229_v17 = vld [vmem:[%s1763_s7 + $0x8] sm:$0xff]  ;;  %v230_v20 = vld [vmem:[%s1763_s7 + $0x10] sm:$0xff] }
  0x18   :  { %v1129_v19 = vpack.c.bf16 %v229_v17, %v228_v16  ;;  %v231_v21 = vld [vmem:[%s1763_s7 + $0x18] sm:$0xff]  ;;  %v1461_v24 = vld [vmem:[%s1764_s9] sm:$0xff]  ;;  %v1466_v25 = vld [vmem:[%s1764_s9 + $0x8] sm:$0xff]  ;;  %v147_v44 = vmul.f32 0.001, %v228_v16 }
  0x19   :  { %v1132_v23 = vpack.c.bf16 %v231_v21, %v230_v20  ;;  %v227_v26 = vld [vmem:[%s1765_s6] sm:$0xff]  ;;  %v1135_v27 = vpack.c.bf16 %v1466_v25, %v1461_v24  ;;  %v1481_v28 = vld [vmem:[%s1764_s9 + $0x10] sm:$0xff]  ;;  %v1486_v29 = vld [vmem:[%s1764_s9 + $0x18] sm:$0xff]  ;;  %s1767_s9 = sld [smem:[#allocation17_spill]]  ;;  %v148_v46 = vmul.f32 0.001, %v229_v17 }
  0x1a   :  { %1130 = vmatpush3.bf16.msra.mxu1 %v1129_v19  ;;  %v1138_v30 = vpack.c.bf16 %v1486_v29, %v1481_v28  ;;  %v1494_v31 = vld [vmem:[%s1766_s27] sm:$0xff]  ;;  %v1499_v32 = vld [vmem:[%s1766_s27 + $0x8] sm:$0xff]  ;;  %v1513_v38 = vld [vmem:[%s1766_s27 + $0x10] sm:$0xff]  ;;  %v149_v54 = vmul.f32 0.001, %v230_v20 }
  0x1b   :  { %1131 = vmatprep.subr.bf16.mxu1 %v1228_v18  ;;  %v1141_v35 = vpack.c.bf16 %v1499_v32, %v1494_v31  ;;  %v1518_v39 = vld [vmem:[%s1766_s27 + $0x18] sm:$0xff]  ;;  %v135_v40 = vld [vmem:[%s1768_s3] sm:$0xff]  ;;  %v136_v42 = vld [vmem:[%s1768_s3 + $0x8] sm:$0xff]  ;;  %v150_v55 = vmul.f32 0.001, %v231_v21  ;;  %s1770_s27 = sld [smem:[#allocation15_spill]] }
  0x1c   :  { %v1144_v41 = vpack.c.bf16 %v1518_v39, %v1513_v38  ;;  %v139_v43 = vmul.f32 0.999, %v135_v40  ;;  %v140_v45 = vmul.f32 0.999, %v136_v42  ;;  %v971_v59 = vld [vmem:[%s1769_s1] ss:$0 sm:$0xff] }
  0x1d   :  { %v160_v17 = vld [vmem:[%s1731_s11] sm:$0xff]  ;;  %v161_v19 = vld [vmem:[%s1731_s11 + $0x8] sm:$0xff]  ;;  %v174_v42 = vmul.f32 0.001, %v1481_v28 }
  0x1e   :  { %1133 = vmatpush3.bf16.msra.mxu1 %v1132_v23  ;;  %v151_v47 = vadd.f32 %v147_v44, %v139_v43  ;;  %v152_v48 = vadd.f32 %v148_v46, %v140_v45  ;;  %v164_v20 = vmul.f32 0.999, %v160_v17  ;;  %v165_v21 = vmul.f32 0.999, %v161_v19  ;;  %v182_v19 = vld [vmem:[%s1769_s1] sm:$0x1] }
  0x1f   :  { %1134 = vmatprep.subr.bf16.mxu1 %v1228_v18  ;;  %v969_v33 = vld [vmem:[%s1767_s9] ss:$0 sm:$0xff]  ;;  %v172_v23 = vmul.f32 0.001, %v1461_v24  ;;  %v175_v43 = vmul.f32 0.001, %v1486_v29  ;;  %v484_v29 = vlaneseq }
  0x20   :  { %211 = vst.msk [vmem:[%s1739_s19] sm:$0xff] %vm210_vm1, %v151_v47  ;;  %v1147_v51 = vpack.c.bf16 %v152_v48, %v151_v47  ;;  %v155_v24 = vld [vmem:[%s1730_s10] sm:$0x1] }
  0x21   :  { %1036 = vmatmul.mubr.msk.f32.vlgmr.msra.gmra.mrb[0].mxu1 %vm210_vm1, %v227_v26  ;;  %v482_v16 = vld [vmem:[%s1770_s27] sm:$0xff]  ;;  %v173_v26 = vmul.f32 0.001, %v1466_v25  ;;  %v485_v47 = vshrl.u32 %v484_v29, 7 }
  0x22   :  { %1136 = vmatpush3.bf16.msra.mxu1 %v1135_v27  ;;  %1046 = vmatprep.mubr.msk.f32.mxu1 %vm1229_vm0, %v1230_v22  ;;  %v176_v27 = vadd.f32 %v172_v23, %v164_v20  ;;  %v157_v25 = vld [vmem:[%s1767_s9] sm:$0x1]  ;;  %v183_v23 = vmul.f32 0.001, %v182_v19 }
  0x23   :  { %1137 = vmatprep.subr.bf16.mxu1 %v1228_v18  ;;  %v158_v40 = vmul.f32 0.001, %v157_v25 }
  0x26   :  { %1139 = vmatpush3.bf16.msra.mxu1 %v1138_v30  ;;  %v177_v30 = vadd.f32 %v173_v26, %v165_v21 }
  0x27   :  { %1140 = vmatprep.subr.bf16.mxu1 %v1228_v18  ;;  %v137_v49 = vld [vmem:[%s1768_s3 + $0x10] sm:$0xff]  ;;  %v138_v50 = vld [vmem:[%s1768_s3 + $0x18] sm:$0xff] }
  0x28   :  { %212 = vst.msk [vmem:[%s1739_s19 + $0x8] sm:$0xff] %vm210_vm1, %v152_v48  ;;  %v141_v52 = vmul.f32 0.999, %v137_v49  ;;  %v142_v53 = vmul.f32 0.999, %v138_v50 }
  0x29   :  { %v973_v48 = vld [vmem:[%s1771_s2] ss:$0 sm:$0xff] }
  0x2a   :  { %v153_v56 = vadd.f32 %v149_v54, %v141_v52  ;;  %v154_v57 = vadd.f32 %v150_v55, %v142_v53  ;;  %v486_v52 = vsub.s32 0, %v485_v47 }
  0x2c   :  { %213 = vst.msk [vmem:[%s1739_s19 + $0x10] sm:$0xff] %vm210_vm1, %v153_v56  ;;  %214 = vst.msk [vmem:[%s1739_s19 + $0x18] sm:$0xff] %vm210_vm1, %v154_v57  ;;  %v1150_v58 = vpack.c.bf16 %v154_v57, %v153_v56 }
  0xf4   :  { %v308_v34 = vpop.f32.mrb[0].mxu1 }
  0xf5   :  { %v309_v36 = vadd.f32 %v969_v33, %v308_v34  ;;  %v1037_v37 = vpop.f32.mrb[1].mxu1  ;;  %v162_v33 = vld [vmem:[%s1731_s11 + $0x10] sm:$0xff]  ;;  %v163_v34 = vld [vmem:[%s1731_s11 + $0x18] sm:$0xff] }
  0xf6   :  { %217 = vst.msk [vmem:[%s1741_s21] sm:$0xff] %vm210_vm1, %v176_v27  ;;  %218 = vst.msk [vmem:[%s1741_s21 + $0x8] sm:$0xff] %vm210_vm1, %v177_v30  ;;  %v156_v37 = vmul.f32 0.999, %v155_v24  ;;  %v200_v24 = vmul.f32 0.001, %v1518_v39 }
  0xf7   :  { %1047 = vmatmul.mubr.msk.f32.vlgmr.msra.gmra.mrb[2].mxu1 %vm210_vm1, %v309_v36  ;;  %v1153_v36 = vpack.c.bf16 %v177_v30, %v176_v27 }
  0xf8   :  { %1142 = vmatpush3.bf16.msra.mxu1 %v1141_v35  ;;  %1057 = vmatprep.mubr.msk.f32.mxu1 %vm1229_vm0, %v1230_v22  ;;  %v166_v35 = vmul.f32 0.999, %v162_v33  ;;  %v159_v44 = vadd.f32 %v158_v40, %v156_v37  ;;  %v205_v37 = vld [vmem:[%s1734_s14] sm:$0x1] }
  0xf9   :  { %1143 = vmatprep.subr.bf16.mxu1 %v1228_v18  ;;  %v206_v39 = vmul.f32 0.999, %v205_v37 }
  0xfa   :  { %v178_v45 = vadd.f32 %v174_v42, %v166_v35  ;;  %216 = vst.msk [vmem:[%s1740_s20] sm:$0x1] %vm215_vm2, %v159_v44  ;;  %v487_v54 = vrot.slane %v159_v44, %v486_v52 }
  0xfc   :  { %1145 = vmatpush3.bf16.msra.mxu1 %v1144_v41  ;;  %v167_v41 = vmul.f32 0.999, %v163_v34  ;;  %219 = vst.msk [vmem:[%s1741_s21 + $0x10] sm:$0xff] %vm210_vm1, %v178_v45  ;;  %v199_v34 = vmul.f32 0.001, %v1513_v38 }
  0xfd   :  { %1146 = vmatprep.subr.bf16.mxu1 %v1228_v18  ;;  %v207_v38 = vld [vmem:[%s1771_s2] sm:$0x1] }
  0xfe   :  { %v179_v46 = vadd.f32 %v175_v43, %v167_v41  ;;  %v208_v40 = vmul.f32 0.001, %v207_v38 }
 0x100   :  { %220 = vst.msk [vmem:[%s1741_s21 + $0x18] sm:$0xff] %vm210_vm1, %v179_v46  ;;  %v1156_v28 = vpack.c.bf16 %v179_v46, %v178_v45  ;;  %v209_v41 = vadd.f32 %v208_v40, %v206_v39 }
 0x102   :  { %226 = vst [vmem:[%s1744_s24] sm:$0x1] %v209_v41 }
 0x1ca   :  { %v392_v60 = vpop.f32.mrb[2].mxu1 }
 0x1cb   :  { %v393_v61 = vadd.f32 %v971_v59, %v392_v60  ;;  %v1048_v62 = vpop.f32.mrb[3].mxu1  ;;  %v186_v59 = vld [vmem:[%s1733_s13 + $0x8] sm:$0xff]  ;;  %v197_v60 = vmul.f32 0.001, %v1494_v31 }
 0x1cd   :  { %v396_v63 = vmax.f32 %v393_v61, 0.0  ;;  %v198_v61 = vmul.f32 0.001, %v1499_v32 }
 0x1cf   :  { %1058 = vmatmul.mubr.msk.f32.vlgmr.msra.gmra.mrb[4].mxu1 %vm210_vm1, %v396_v63  ;;  %v190_v63 = vmul.f32 0.999, %v186_v59 }
 0x1d0   :  { %1148 = vmatpush3.bf16.msra.mxu1 %v1147_v51  ;;  %1068 = vmatprep.mubr.msk.f32.mxu1 %vm1229_vm0, %v1230_v22 }
 0x1d1   :  { %1149 = vmatprep.subr.bf16.mxu1 %v1228_v18  ;;  %v202_v21 = vadd.f32 %v198_v61, %v190_v63 }
 0x1d4   :  { %1151 = vmatpush3.bf16.msra.mxu1 %v1150_v58  ;;  %v185_v58 = vld [vmem:[%s1733_s13] sm:$0xff] }
 0x1d5   :  { %1152 = vmatprep.subr.bf16.mxu1 %v1228_v18  ;;  %v189_v62 = vmul.f32 0.999, %v185_v58  ;;  %223 = vst [vmem:[%s1743_s23 + $0x8] sm:$0xff] %v202_v21 }
 0x1d7   :  { %1069 = vmatmul.mubr.msk.f32.vlgmr.msra.gmra.mrb[6].mxu1 %vm210_vm1, %v482_v16  ;;  %v180_v16 = vld [vmem:[%s1732_s12] sm:$0x1]  ;;  %v201_v20 = vadd.f32 %v197_v60, %v189_v62 }
 0x1d8   :  { %1079 = vmatprep.mubr.msk.f32.mxu1 %vm1229_vm0, %v1230_v22  ;;  %1154 = vmatpush3.bf16.msra.mxu1 %v1153_v36  ;;  %v181_v17 = vmul.f32 0.999, %v180_v16 }
 0x1d9   :  { %1155 = vmatprep.subr.bf16.mxu1 %v1228_v18  ;;  %222 = vst [vmem:[%s1743_s23] sm:$0xff] %v201_v20  ;;  %v1159_v31 = vpack.c.bf16 %v202_v21, %v201_v20 }
 0x1da   :  { %v184_v32 = vadd.f32 %v183_v23, %v181_v17 }
 0x1dc   :  { %1157 = vmatpush3.bf16.msra.mxu1 %v1156_v28  ;;  %221 = vst.msk [vmem:[%s1742_s22] sm:$0x1] %vm215_vm2, %v184_v32  ;;  %v566_v42 = vrot.slane %v184_v32, %v486_v52  ;;  %v646_v28 = vrot.slane %v209_v41, %v486_v52 }
 0x1dd   :  { %1158 = vmatprep.subr.bf16.mxu1 %v1228_v18 }
 0x1e0   :  { %v187_v26 = vld [vmem:[%s1733_s13 + $0x10] sm:$0xff]  ;;  %v188_v27 = vld [vmem:[%s1733_s13 + $0x18] sm:$0xff] }
 0x1e1   :  { %v191_v30 = vmul.f32 0.999, %v187_v26  ;;  %v192_v33 = vmul.f32 0.999, %v188_v27  ;;  %v1165_v26 = vpack.c.bf16 %v1370_v1, %v1365_v0 }
 0x1e3   :  { %v203_v25 = vadd.f32 %v199_v34, %v191_v30  ;;  %v204_v35 = vadd.f32 %v200_v24, %v192_v33 }
 0x1e5   :  { %224 = vst [vmem:[%s1743_s23 + $0x10] sm:$0xff] %v203_v25  ;;  %225 = vst [vmem:[%s1743_s23 + $0x18] sm:$0xff] %v204_v35  ;;  %v1162_v36 = vpack.c.bf16 %v204_v35, %v203_v25 }
 0x2a2   :  { %v477_v49 = vpop.f32.mrb[4].mxu1 }
 0x2a3   :  { %v1612_v50 = vadd.f32 %v973_v48, %v477_v49  ;;  %v1059_v51 = vpop.f32.mrb[5].mxu1 }
 0x2a5   :  { %481 = vst [vmem:[#allocation6] sm:$0xff] %v1612_v50  ;;  %v721_v53 = vmul.f32 %v1612_v50, %v1612_v50 }
 0x2a7   :  { %722 = vadd.xlane.f32.xlu0 %v721_v53 }
 0x2aa   :  { %v558_v55 = vpop.f32.mrb[6].mxu1 }
 0x2ab   :  { %v559_v56 = vadd.f32 %v558_v55, %v487_v54  ;;  %v1070_v57 = vpop.f32.mrb[7].mxu1 }
 0x2ad   :  { %1080 = vmatmul.mubr.msk.f32.vlgmr.msra.gmra.mrb[8].mxu1 %vm210_vm1, %v559_v56 }
 0x2ae   :  { %1090 = vmatprep.mubr.msk.f32.mxu1 %vm1229_vm0, %v1230_v22  ;;  %1160 = vmatpush3.bf16.msra.mxu1 %v1159_v31 }
 0x2af   :  { %1161 = vmatprep.subr.bf16.mxu1 %v1228_v18 }
 0x2b2   :  { %1163 = vmatpush3.bf16.msra.mxu1 %v1162_v36 }
 0x334   :  { %v723_v51 = vpop.xlane.xlu0 %722 }
 0x335   :  { %1192 = vrsqrt.f32 %v723_v51  ;;  %vm726_vm3 = vcmp.eq.f32.partialorder %v723_v51, inf  ;;  %v729_v57 = vand.u32 2147483648, %v723_v51  ;;  %vm728_vm4 = vcmp.eq.f32.partialorder %v723_v51, 0.0 }
 0x33f   :  { %v1193_v53 = vpop.eup %1192 }
 0x340   :  { %v725_v55 = vmul.f32 %v1193_v53, %v723_v51 }
 0x342   :  { %v727_v56 = vsel %vm726_vm3, %v723_v51, %v725_v55 }
 0x343   :  { %v730_v58 = vsel %vm728_vm4, %v729_v57, %v727_v56 }
 0x344   :  { %v731_v61 = vmax.f32 %v730_v58, 1e-12 }
 0x380   :  { %v637_v43 = vpop.f32.mrb[8].mxu1 }
 0x381   :  { %v638_v44 = vadd.f32 %v637_v43, %v566_v42  ;;  %v1081_v45 = vpop.f32.mrb[9].mxu1 }
 0x383   :  { %v641_v46 = vmax.f32 %v638_v44, 0.0 }
 0x385   :  { %1091 = vmatmul.mubr.msk.f32.vlgmr.msra.gmra.mrb[10].mxu1 %vm210_vm1, %v641_v46 }
 0x458   :  { %v717_v29 = vpop.f32.mrb[10].mxu1 }
 0x459   :  { %v718_v47 = vadd.f32 %v717_v29, %v646_v28  ;;  %v1092_v48 = vpop.f32.mrb[11].mxu1 }
 0x45b   :  { %v734_v49 = vmul.f32 %v718_v47, %v718_v47 }
 0x45d   :  { %735 = vadd.xlane.f32.xlu0 %v734_v49 }
 0x4ea   :  { %v736_v54 = vpop.xlane.xlu0 %735 }
 0x4eb   :  { %1194 = vrsqrt.f32 %v736_v54  ;;  %vm739_vm5 = vcmp.eq.f32.partialorder %v736_v54, inf  ;;  %v742_v52 = vand.u32 2147483648, %v736_v54  ;;  %vm741_vm6 = vcmp.eq.f32.partialorder %v736_v54, 0.0 }
 0x4ec   :  { %1196 = vrcp.f32 %v731_v61 }
 0x4f5   :  { %v1195_v59 = vpop.eup %1194 }
 0x4f6   :  { %v738_v60 = vmul.f32 %v1195_v59, %v736_v54  ;;  %v1197_v17 = vpop.eup %1196 }
 0x4f7   :  { %v733_v20 = vmul.f32 %v1197_v17, %v1612_v50 }
 0x4f8   :  { %v740_v62 = vsel %vm739_vm5, %v736_v54, %v738_v60 }
 0x4f9   :  { %v743_v63 = vsel %vm741_vm6, %v742_v52, %v740_v62 }
 0x4fa   :  { %v744_v16 = vmax.f32 %v743_v63, 1e-12 }
 0x4fc   :  { %1198 = vrcp.f32 %v744_v16 }
 0x506   :  { %v1199_v19 = vpop.eup %1198 }
 0x507   :  { %v746_v21 = vmul.f32 %v1199_v19, %v718_v47 }
 0x509   :  { %v748_v23 = vmul.f32 %v746_v21, %v733_v20 }
 0x50b   :  { %749 = vadd.xlane.f32.xlu1 %v748_v23 }
 0x598   :  { %v750_v31 = vpop.xlane.xlu1 %749 }
 0x599   :  { %v751_v32 = vmul.f32 14.285714, %v750_v31 }
 0x59b   :  { %753 = vst.msk [vmem:[%s1736_s16] sm:$0xff] %vm752_vm7, %v751_v32 }
 0x59c   :  { %1222 = dma.done.wait [#allocation4], 2048 }
 0x59d   :  { %1223 = vsyncadd [#allocation4], 4294965248  ;;  %1125 = vmatprep.mubr.msk.f32.mxu0 %vm1229_vm0, %v1230_v22  ;;  %1166 = vmatpush3.bf16.xpose.msra.mxu0 %v1165_v26  ;;  %v1168_v50 = vpack.c.bf16 %v1380_v3, %v1375_v2  ;;  %v1171_v27 = vpack.c.bf16 %v1390_v5, %v1385_v4  ;;  %v1174_v0 = vpack.c.bf16 %v1400_v7, %v1395_v6  ;;  %s1772_s2 = sld [smem:[#allocation13_spill]] }
 0x59e   :  { %1167 = vmatprep.subr.bf16.mxu0 %v1228_v18  ;;  %v1177_v1 = vpack.c.bf16 %v1410_v9, %v1405_v8  ;;  %v1180_v2 = vpack.c.bf16 %v1420_v11, %v1415_v10  ;;  %v1183_v3 = vpack.c.bf16 %v1430_v13, %v1425_v12  ;;  %v1186_v4 = vpack.c.bf16 %v1440_v15, %v1435_v14 }
 0x5a3   :  { %s846_s8 = scalar_lea.vmem %s1745_s25, %s1772_s2 }
 0x5a4   :  { %881 = vst [vmem:[%s846_s8] sm:$0xff] %v746_v21 }
 0x5a5   :  { %1169 = vmatpush3.bf16.xpose.msra.mxu0 %v1168_v50 }
 0x5a6   :  { %1170 = vmatprep.subr.bf16.mxu0 %v1228_v18 }
 0x5ad   :  { %1172 = vmatpush3.bf16.xpose.msra.mxu0 %v1171_v27 }
 0x5ae   :  { %1173 = vmatprep.subr.bf16.mxu0 %v1228_v18 }
 0x5b5   :  { %1175 = vmatpush3.bf16.xpose.msra.mxu0 %v1174_v0 }
 0x5b6   :  { %1176 = vmatprep.subr.bf16.mxu0 %v1228_v18 }
 0x5bd   :  { %1178 = vmatpush3.bf16.xpose.msra.mxu0 %v1177_v1 }
 0x5be   :  { %1179 = vmatprep.subr.bf16.mxu0 %v1228_v18 }
 0x5c5   :  { %1181 = vmatpush3.bf16.xpose.msra.mxu0 %v1180_v2 }
 0x5c6   :  { %1182 = vmatprep.subr.bf16.mxu0 %v1228_v18 }
 0x5cd   :  { %1184 = vmatpush3.bf16.xpose.msra.mxu0 %v1183_v3 }
 0x5ce   :  { %1185 = vmatprep.subr.bf16.mxu0 %v1228_v18 }
 0x5d5   :  { %1187 = vmatpush3.bf16.xpose.msra.mxu0 %v1186_v4 }
 0x5dc   :  { %1126 = vmatmul.mubr.f32.vlgmr.msra.gmra.mrb[0].mxu0 %v733_v20 }
 0x6af   :  { %v839_v5 = vpop.f32.mrb[0].mxu0 }
 0x6b0   :  { %v843_v6 = vmul.f32 14.285714, %v839_v5  ;;  %v1127_v7 = vpop.f32.mrb[1].mxu0 }
 0x6b2   :  { %844 = vst [vmem:[%s1737_s17] sm:$0xff] %v843_v6 }
 0x6b3   :  { %889 = vsyncadd [#allocation4 + $0x1], 128 }
 0x6b4   :  { %1224 = dma.done.wait [#allocation4 + $0x1], 128 }
 0x6b5   :  { %1225 = vsyncadd [#allocation4 + $0x1], 4294967168  ;;  %s1231_s15 = smov [#allocation6]  }
 0x6b6   :  { %s903_s10 = sshll.u32 %s1231_s15, 4  ;;  %s904_s10 = int_to_ptr.vmem [resolvable:$true] %s903_s10 }
 0x6b7   :  { %s1200_s12 = scalar_lea.vmem %s904_s10, 128  ;;  %p1205_p1 = scmp.lt.s32.totalorder %s904_s10, %s904_s10 }
 0x6b8   :  { %p1201_p0 = scmp.ne.s32.totalorder %s904_s10, %s1200_s12  ;;  %p1206_p2 = scmp.lt.s32.totalorder %s1200_s12, %s1200_s12 }
 0x6ba   :  { %p1207_p3 = por %p1206_p2, %p1205_p1 }
 0x6bc   :  { %p1208_p4 = pnand %p1207_p3, %p1201_p0 }
 0x6be   :  { %1211 = shalt.err (!%p1208_p4)
}
 0x6bf   :  { %s1212_s1 = scalar_lea.hbm %s1738_s18, 128 }
 0x6c0   :  { %p1213_p5 = scmp.ne.s32.totalorder %s1738_s18, %s1212_s1  ;;  %p1216_p6 = scmp.lt.u32.totalorder %s1212_s1, %s1738_s18 }
 0x6c2   :  { %p1218_p7 = pnand %p1216_p6, %p1213_p5 }
 0x6c4   :  { %1221 = shalt.err (!%p1218_p7)
}
 0x6c5   :  { %906 = dma.vmem_to_hbm [thread:$0]  %s904_s10, 128, %s1738_s18, [#allocation7]  }
 0x6c6   :  { %1226 = dma.done.wait [#allocation7], 128  }
 0x6c7   :  { %1227 = vsyncadd [#allocation7], 4294967168 }
 0x6c8   :  { %938 = vsyncpa [#allocation7], 1 }
 0x6c9   :  { %939 = vsyncmov [#allocation4] }
 0x6cc   :  { %s940_s0 = vpop.sfrf %939 }
 0x6cd   :  { %p978_p8 = scmp.ne.s32.totalorder %s940_s0, 0 }
 0x6cf   :  { %944 = shalt.err (%p978_p8)  }
 0x6d0   :  { %946 = vsyncmov [#allocation4 + $0x1] }
 0x6d3   :  { %s947_s29 = vpop.sfrf %946 }
 0x6d4   :  { %p979_p9 = scmp.ne.s32.totalorder %s947_s29, 0 }
 0x6d6   :  { %951 = shalt.err (%p979_p9)  }

</bundles_post_ra>
